<compile_context>
chip_gen: v7x
topology: tpu7x:2x2x1
jax: 0.10.0
libtpu: 0.0.40
codegen_flags: <defaults>
</compile_context>

<pallas_src>
import functools

import jax
import jax.numpy as jnp
from jax import lax
from jax.experimental import pallas as pl
from jax.experimental.pallas import tpu as pltpu


def _round_up(x, m):
    return ((x + m - 1) // m) * m


def _choose_tiling(B, block_rows):
    """Pick (b_tile, B_pad) for a lane-dense (1, B_pad) output.

    Multi-tile lane blocks must be multiples of 128; the tile is capped at
    half the (128-rounded) batch so the 'parallel' grid axis has >= 2 steps
    (v7x dual-TensorCore sharding).  Small batches use one full-array tile.
    """
    B8 = _round_up(B, 8)
    if B8 <= 128:
        return B8, B8
    block_rows = max(128, (block_rows // 128) * 128)
    B128 = _round_up(B, 128)
    half = _round_up(B128 // 2, 128)
    b_tile = min(block_rows, half)
    return b_tile, _round_up(B, b_tile)


def _vmem_capacity_bytes():
    try:
        cap = getattr(pltpu.get_tpu_info(), "vmem_capacity_bytes", None)
        if cap:
            return int(cap)
    except Exception:
        pass
    return 64 * 1024 * 1024      # v7x per-TensorCore floor


# ----------------------------------------------------------------------------
# Pallas kernel
# ----------------------------------------------------------------------------
def make_ncf_kernel(num_layers, in_kernel_gather):
    """Fused NeuMF forward for one batch tile.

    Ref order (in_kernel_gather=True):
      uidx, iidx              (bt, 1) int32 user/item ids
      tug, tig, tum, tim      resident embedding tables
      w0_top, w0_bot, b0      first MLP layer, split weight
      (w_i, b_i) x (L-1)      remaining MLP layers
      wp_g, wp_m, bp          predict weight halves (rows) + bias
      out                     (1, bt) prediction row
    Ref order (in_kernel_gather=False): ug, ig, um, im pre-gathered blocks
    replace the ids/tables; the rest is identical.
    """

    def kernel(*refs):
        if in_kernel_gather:
            uidx_ref, iidx_ref = refs[0], refs[1]
            tug_ref, tig_ref, tum_ref, tim_ref = refs[2], refs[3], refs[4], refs[5]
            idx = 6
        else:
            ug_ref, ig_ref, um_ref, im_ref = refs[0], refs[1], refs[2], refs[3]
            idx = 4
        w0t_ref, w0b_ref, b0_ref = refs[idx], refs[idx + 1], refs[idx + 2]
        idx += 3
        rest = []
        for _ in range(num_layers - 1):
            rest.append((refs[idx], refs[idx + 1]))
            idx += 2
        wp_g_ref, wp_m_ref, bp_ref = refs[idx], refs[idx + 1], refs[idx + 2]
        out_ref = refs[idx + 3]

        if in_kernel_gather:
            bt = out_ref.shape[1]
            emb_dt = tug_ref.dtype
            u_col = uidx_ref[...]                      # (bt, 1) int32
            i_col = iidx_ref[...]
            vu = tug_ref.shape[0]
            vi = tig_ref.shape[0]
            # One-hot row gather on the MXU: exact copies of the table rows.
            oh_u = (u_col == lax.broadcasted_iota(jnp.int32, (bt, vu), 1)
                    ).astype(emb_dt)
            oh_i = (i_col == lax.broadcasted_iota(jnp.int32, (bt, vi), 1)
                    ).astype(emb_dt)
            ug = jnp.dot(oh_u, tug_ref[...], preferred_element_type=jnp.float32)
            ig = jnp.dot(oh_i, tig_ref[...], preferred_element_type=jnp.float32)
            um = jnp.dot(oh_u, tum_ref[...], preferred_element_type=jnp.float32)
            im = jnp.dot(oh_i, tim_ref[...], preferred_element_type=jnp.float32)
        else:
            ug = ug_ref[...].astype(jnp.float32)
            ig = ig_ref[...].astype(jnp.float32)
            um = um_ref[...]
            im = im_ref[...]

        # ---- GMF branch: elementwise product in f32 (VPU) -------------------
        out_gmf = ug * ig

        # ---- MLP branch (MXU, f32 accumulation).  First layer uses the split
        # weight so concat([um, im]) never materializes; inputs are cast to the
        # weight dtype to pin the bf16 MXU path.
        w_dt = w0t_ref.dtype
        x = (jnp.dot(um.astype(w_dt), w0t_ref[...],
                     preferred_element_type=jnp.float32)
             + jnp.dot(im.astype(w_dt), w0b_ref[...],
                       preferred_element_type=jnp.float32)
             + b0_ref[...])
        x = jnp.maximum(x, 0.0)
        for w_ref, b_ref in rest:                      # static unroll
            x = jnp.dot(x.astype(w_ref.dtype), w_ref[...],
                        preferred_element_type=jnp.float32)
            x = jnp.maximum(x + b_ref[...], 0.0)

        # ---- Predict layer: 1-wide output -> VPU multiply + XLU lane-reduce
        # instead of two N=1 MXU matmuls.
        pred = (jnp.sum(out_gmf * wp_g_ref[...], axis=-1, keepdims=True)
                + jnp.sum(x * wp_m_ref[...], axis=-1, keepdims=True)
                + bp_ref[...])                         # (bt, 1)
        # Lane-dense store: column -> row (small XLU transpose; unit is idle).
        out_ref[...] = jnp.transpose(pred).astype(out_ref.dtype)

    return kernel


# ----------------------------------------------------------------------------
# Parameter init (mirrors the PyTorch _init_weight_ scheme for model='NeuMF')
# ----------------------------------------------------------------------------
def init_ncf_params(key, user_num, item_num, factor_num, num_layers,
                    param_dtype=jnp.bfloat16):
    ks = jax.random.split(key, 6 + num_layers)
    mlp_embed_dim = factor_num * 2 ** (num_layers - 1)

    params = {}
    # Embeddings ~ N(0, 0.01)
    params["embed_user_GMF"] = (0.01 * jax.random.normal(
        ks[0], (user_num, factor_num), jnp.float32)).astype(param_dtype)
    params["embed_item_GMF"] = (0.01 * jax.random.normal(
        ks[1], (item_num, factor_num), jnp.float32)).astype(param_dtype)
    params["embed_user_MLP"] = (0.01 * jax.random.normal(
        ks[2], (user_num, mlp_embed_dim), jnp.float32)).astype(param_dtype)
    params["embed_item_MLP"] = (0.01 * jax.random.normal(
        ks[3], (item_num, mlp_embed_dim), jnp.float32)).astype(param_dtype)

    # MLP tower: Linear(in, in//2), xavier_uniform weights, zero bias.
    # Weights stored pre-transposed as (in, out) so y = x @ W + b.
    mlp = []
    for i in range(num_layers):
        in_size = factor_num * 2 ** (num_layers - i)
        out_size = in_size // 2
        limit = (6.0 / (in_size + out_size)) ** 0.5
        w = jax.random.uniform(ks[4 + i], (in_size, out_size), jnp.float32,
                               minval=-limit, maxval=limit).astype(param_dtype)
        b = jnp.zeros((1, out_size), jnp.float32)      # biases stay f32
        mlp.append((w, b))
    params["mlp"] = mlp

    # Predict layer: kaiming_uniform(a=1, 'sigmoid') -> bound = sqrt(3 / fan_in)
    predict_size = 2 * factor_num
    bound = (3.0 / predict_size) ** 0.5
    params["predict_w"] = jax.random.uniform(
        ks[4 + num_layers], (predict_size, 1), jnp.float32,
        minval=-bound, maxval=bound)
    params["predict_b"] = jnp.zeros((1, 1), jnp.float32)
    return params


# ----------------------------------------------------------------------------
# Forward wrapper
# ----------------------------------------------------------------------------
@functools.partial(
    jax.jit,
    static_argnames=("num_layers", "factor_num", "block_rows", "force_fallback"))
def ncf_forward(params, user, item, *, num_layers, factor_num,
                block_rows=1024, force_fallback=False):
    B = user.shape[0]
    b_tile, B_pad = _choose_tiling(B, block_rows)
    grid = (B_pad // b_tile,)

    F = factor_num
    Fm = factor_num * 2 ** (num_layers - 1)

    user_flat = jnp.pad(user.astype(jnp.int32), (0, B_pad - B))  # idx 0 is valid
    item_flat = jnp.pad(item.astype(jnp.int32), (0, B_pad - B))

    tables = [params["embed_user_GMF"], params["embed_item_GMF"],
              params["embed_user_MLP"], params["embed_item_MLP"]]
    mlp = params["mlp"]

    # ---- static residency decision (shapes/dtypes are static under jit) ----
    table_bytes = sum(t.size * t.dtype.itemsize for t in tables)
    weight_bytes = sum(w.size * w.dtype.itemsize + b.size * b.dtype.itemsize
                       for w, b in mlp)
    vmem_cap = _vmem_capacity_bytes()          # 64 MiB/TC on v7x, 128 MiB else
    max_vocab = max(t.shape[0] for t in tables)
    use_in_kernel_gather = (
        (not force_fallback)
        and 2 * (table_bytes + weight_bytes) <= int(0.5 * vmem_cap)  # 2x: dbl buf
        and max_vocab <= 4096)                 # one-hot gather cost gate

    # ---- resident weights (same for both paths) -----------------------------
    w0, b0 = mlp[0]
    w0_top, w0_bot = w0[:Fm, :], w0[Fm:, :]    # split -> no (B, 2Fm) concat
    weight_inputs = [w0_top, w0_bot, b0]
    for w, b in mlp[1:]:
        weight_inputs += [w, b]
    wp = params["predict_w"].astype(jnp.float32)
    wp_g = wp[:F, 0].reshape(1, F)             # row vectors for VPU broadcast
    wp_m = wp[F:, 0].reshape(1, F)
    bp = params["predict_b"].astype(jnp.float32).reshape(1, 1)
    weight_inputs += [wp_g, wp_m, bp]

    if use_in_kernel_gather:
        kernel_inputs = [user_flat.reshape(B_pad, 1),
                         item_flat.reshape(B_pad, 1)] + tables
        in_specs = [pl.BlockSpec((b_tile, 1), lambda i: (i, 0)),
                    pl.BlockSpec((b_tile, 1), lambda i: (i, 0))]
        in_specs += [pl.BlockSpec(t.shape, lambda i: (0, 0)) for t in tables]
    else:
        # TODO(synk): for huge tables, gather inside the kernel with per-row
        # pltpu.make_async_copy from memory_space=pl.ANY tables (double-
        # buffered slab) instead of this JAX-side take (extra HBM round trip).
        ug = jnp.take(tables[0], user_flat, axis=0)    # stays in table dtype
        ig = jnp.take(tables[1], item_flat, axis=0)    # (bf16 default stream)
        um = jnp.take(tables[2], user_flat, axis=0)
        im = jnp.take(tables[3], item_flat, axis=0)
        kernel_inputs = [ug, ig, um, im]
        in_specs = [pl.BlockSpec((b_tile, F), lambda i: (i, 0)),
                    pl.BlockSpec((b_tile, F), lambda i: (i, 0)),
                    pl.BlockSpec((b_tile, Fm), lambda i: (i, 0)),
                    pl.BlockSpec((b_tile, Fm), lambda i: (i, 0))]

    kernel_inputs += weight_inputs
    in_specs += [pl.BlockSpec(a.shape, lambda i: (0, 0)) for a in weight_inputs]

    compiler_kwargs = dict(dimension_semantics=("parallel",))
    resident_bytes = 2 * (weight_bytes
                          + (table_bytes if use_in_kernel_gather else 0))
    if resident_bytes > 24 * 2 ** 20:          # only raise the limit if needed
        compiler_kwargs["vmem_limit_bytes"] = min(
            resident_bytes + (16 << 20), int(0.9 * vmem_cap))

    out = pl.pallas_call(
        make_ncf_kernel(num_layers, use_in_kernel_gather),
        out_shape=jax.ShapeDtypeStruct((1, B_pad), jnp.float32),  # lane-dense
        grid=grid,
        in_specs=in_specs,
        out_specs=pl.BlockSpec((1, b_tile), lambda i: (0, i)),
        compiler_params=pltpu.CompilerParams(**compiler_kwargs),
    )(*kernel_inputs)

    return out[0, :B]                          # prediction.view(-1)


# ----------------------------------------------------------------------------
# Pure-JAX reference (f32 math on the same parameters)
# ----------------------------------------------------------------------------
def ncf_forward_ref(params, user, item, *, num_layers, factor_num):
    f32 = jnp.float32
    ug = jnp.take(params["embed_user_GMF"], user, axis=0).astype(f32)
    ig = jnp.take(params["embed_item_GMF"], item, axis=0).astype(f32)
    um = jnp.take(params["embed_user_MLP"], user, axis=0).astype(f32)
    im = jnp.take(params["embed_item_MLP"], item, axis=0).astype(f32)
    out_gmf = ug * ig
    x = jnp.concatenate([um, im], axis=-1)
    for w, b in params["mlp"]:
        x = jnp.maximum(x @ w.astype(f32) + b.astype(f32), 0.0)
    concat = jnp.concatenate([out_gmf, x], axis=-1)
    return (concat @ params["predict_w"].astype(f32)
            + params["predict_b"].astype(f32)).reshape(-1)


if __name__ == "__main__":
    user_num, item_num = 64, 96
    factor_num = 32
    num_layers = 3               # MLP embed dim = 128; interaction = 256
    batch = 8

    key = jax.random.PRNGKey(0)
    pkey, ukey, ikey = jax.random.split(key, 3)
    params = init_ncf_params(pkey, user_num, item_num, factor_num, num_layers)

    user = jax.random.randint(ukey, (batch,), 0, user_num, dtype=jnp.int32)
    item = jax.random.randint(ikey, (batch,), 0, item_num, dtype=jnp.int32)

    # ---- in-kernel gather, single tile --------------------------------------
    pred = jax.block_until_ready(
        ncf_forward(params, user, item,
                    num_layers=num_layers, factor_num=factor_num))
    ref = ncf_forward_ref(params, user, item,
                          num_layers=num_layers, factor_num=factor_num)
    assert pred.shape == (batch,)
    assert jnp.allclose(pred, ref, atol=2e-4, rtol=2e-2), (pred, ref)

    # ---- in-kernel gather, multi-tile grid (>= 2 steps -> both v7x TCs) -----
    big_b = 200
    ukey2, ikey2 = jax.random.split(jax.random.PRNGKey(1))
    user2 = jax.random.randint(ukey2, (big_b,), 0, user_num, dtype=jnp.int32)
    item2 = jax.random.randint(ikey2, (big_b,), 0, item_num, dtype=jnp.int32)
    pred2 = jax.block_until_ready(
        ncf_forward(params, user2, item2,
                    num_layers=num_layers, factor_num=factor_num))
    ref2 = ncf_forward_ref(params, user2, item2,
                           num_layers=num_layers, factor_num=factor_num)
    assert pred2.shape == (big_b,)
    assert jnp.allclose(pred2, ref2, atol=2e-4, rtol=2e-2)

    # ---- large-table fallback path (JAX-side gather, bf16 streams) ----------
    pred3 = jax.block_until_ready(
        ncf_forward(params, user2, item2, num_layers=num_layers,
                    factor_num=factor_num, force_fallback=True))
    assert jnp.allclose(pred3, ref2, atol=2e-4, rtol=2e-2)

    print("KERNEL_OK")
</pallas_src>

<mosaic_0001>
module attributes {stable_mosaic.version = 11 : i64} {
  func.func @kernel(%arg0: i32, %arg1: memref<8x1xi32, #tpu.memory_space<vmem>>, %arg2: memref<8x1xi32, #tpu.memory_space<vmem>>, %arg3: memref<64x32xbf16, #tpu.memory_space<vmem>>, %arg4: memref<96x32xbf16, #tpu.memory_space<vmem>>, %arg5: memref<64x128xbf16, #tpu.memory_space<vmem>>, %arg6: memref<96x128xbf16, #tpu.memory_space<vmem>>, %arg7: memref<128x128xbf16, #tpu.memory_space<vmem>>, %arg8: memref<128x128xbf16, #tpu.memory_space<vmem>>, %arg9: memref<1x128xf32, #tpu.memory_space<vmem>>, %arg10: memref<128x64xbf16, #tpu.memory_space<vmem>>, %arg11: memref<1x64xf32, #tpu.memory_space<vmem>>, %arg12: memref<64x32xbf16, #tpu.memory_space<vmem>>, %arg13: memref<1x32xf32, #tpu.memory_space<vmem>>, %arg14: memref<1x32xf32, #tpu.memory_space<vmem>>, %arg15: memref<1x32xf32, #tpu.memory_space<vmem>>, %arg16: memref<1x1xf32, #tpu.memory_space<vmem>>, %arg17: memref<1x8xf32, #tpu.memory_space<vmem>>) attributes {dimension_semantics = [#tpu.dimension_semantics<parallel>], iteration_bounds = array<i64: 1>, scalar_prefetch = 0 : i64, scratch_operands = 0 : i64, tpu.core_type = #tpu.core_type<tc>, window_params = [{transform_indices = @transform_0, window_bounds = array<i64: 8, 1>}, {transform_indices = @transform_1, window_bounds = array<i64: 8, 1>}, {pipeline_mode = #tpu.pipeline_mode<synchronous>, transform_indices = @transform_2, window_bounds = array<i64: 64, 32>}, {pipeline_mode = #tpu.pipeline_mode<synchronous>, transform_indices = @transform_3, window_bounds = array<i64: 96, 32>}, {pipeline_mode = #tpu.pipeline_mode<synchronous>, transform_indices = @transform_4, window_bounds = array<i64: 64, 128>}, {pipeline_mode = #tpu.pipeline_mode<synchronous>, transform_indices = @transform_5, window_bounds = array<i64: 96, 128>}, {pipeline_mode = #tpu.pipeline_mode<synchronous>, transform_indices = @transform_6, window_bounds = array<i64: 128, 128>}, {pipeline_mode = #tpu.pipeline_mode<synchronous>, transform_indices = @transform_7, window_bounds = array<i64: 128, 128>}, {pipeline_mode = #tpu.pipeline_mode<synchronous>, transform_indices = @transform_8, window_bounds = array<i64: 1, 128>}, {pipeline_mode = #tpu.pipeline_mode<synchronous>, transform_indices = @transform_9, window_bounds = array<i64: 128, 64>}, {pipeline_mode = #tpu.pipeline_mode<synchronous>, transform_indices = @transform_10, window_bounds = array<i64: 1, 64>}, {pipeline_mode = #tpu.pipeline_mode<synchronous>, transform_indices = @transform_11, window_bounds = array<i64: 64, 32>}, {pipeline_mode = #tpu.pipeline_mode<synchronous>, transform_indices = @transform_12, window_bounds = array<i64: 1, 32>}, {pipeline_mode = #tpu.pipeline_mode<synchronous>, transform_indices = @transform_13, window_bounds = array<i64: 1, 32>}, {pipeline_mode = #tpu.pipeline_mode<synchronous>, transform_indices = @transform_14, window_bounds = array<i64: 1, 32>}, {pipeline_mode = #tpu.pipeline_mode<synchronous>, transform_indices = @transform_15, window_bounds = array<i64: 1, 1>}, {transform_indices = @transform_16, window_bounds = array<i64: 1, 8>}]} {
    %c0 = arith.constant 0 : index
    %c0_0 = arith.constant 0 : index
    %0 = vector.load %arg1[%c0, %c0_0] : memref<8x1xi32, #tpu.memory_space<vmem>>, vector<8x1xi32>
    %c0_1 = arith.constant 0 : index
    %c0_2 = arith.constant 0 : index
    %1 = vector.load %arg2[%c0_1, %c0_2] : memref<8x1xi32, #tpu.memory_space<vmem>>, vector<8x1xi32>
    %2 = tpu.iota {dimensions = array<i32: 1>} : vector<8x64xi32>
    %3 = vector.broadcast %0 : vector<8x1xi32> to vector<8x64xi32>
    %4 = arith.cmpi eq, %3, %2 : vector<8x64xi32>
    %5 = arith.extui %4 : vector<8x64xi1> to vector<8x64xi32>
    %6 = arith.sitofp %5 : vector<8x64xi32> to vector<8x64xf32>
    %7 = arith.truncf %6 : vector<8x64xf32> to vector<8x64xbf16>
    %8 = tpu.iota {dimensions = array<i32: 1>} : vector<8x96xi32>
    %9 = vector.broadcast %1 : vector<8x1xi32> to vector<8x96xi32>
    %10 = arith.cmpi eq, %9, %8 : vector<8x96xi32>
    %11 = arith.extui %10 : vector<8x96xi1> to vector<8x96xi32>
    %12 = arith.sitofp %11 : vector<8x96xi32> to vector<8x96xf32>
    %13 = arith.truncf %12 : vector<8x96xf32> to vector<8x96xbf16>
    %c0_3 = arith.constant 0 : index
    %c0_4 = arith.constant 0 : index
    %14 = vector.load %arg3[%c0_3, %c0_4] : memref<64x32xbf16, #tpu.memory_space<vmem>>, vector<64x32xbf16>
    %cst = arith.constant dense<0.000000e+00> : vector<8x32xf32>
    %15 = tpu.matmul %7, %14, %cst {dimension_numbers = #tpu.dot_dimension_numbers<[1], [0], [0], [1], [0, 0, 1, 1], [], []>} : vector<8x64xbf16>, vector<64x32xbf16>, vector<8x32xf32> -> vector<8x32xf32>
    %c0_5 = arith.constant 0 : index
    %c0_6 = arith.constant 0 : index
    %16 = vector.load %arg4[%c0_5, %c0_6] : memref<96x32xbf16, #tpu.memory_space<vmem>>, vector<96x32xbf16>
    %cst_7 = arith.constant dense<0.000000e+00> : vector<8x32xf32>
    %17 = tpu.matmul %13, %16, %cst_7 {dimension_numbers = #tpu.dot_dimension_numbers<[1], [0], [0], [1], [0, 0, 1, 1], [], []>} : vector<8x96xbf16>, vector<96x32xbf16>, vector<8x32xf32> -> vector<8x32xf32>
    %c0_8 = arith.constant 0 : index
    %c0_9 = arith.constant 0 : index
    %18 = vector.load %arg5[%c0_8, %c0_9] : memref<64x128xbf16, #tpu.memory_space<vmem>>, vector<64x128xbf16>
    %cst_10 = arith.constant dense<0.000000e+00> : vector<8x128xf32>
    %19 = tpu.matmul %7, %18, %cst_10 {dimension_numbers = #tpu.dot_dimension_numbers<[1], [0], [0], [1], [0, 0, 1, 1], [], []>} : vector<8x64xbf16>, vector<64x128xbf16>, vector<8x128xf32> -> vector<8x128xf32>
    %c0_11 = arith.constant 0 : index
    %c0_12 = arith.constant 0 : index
    %20 = vector.load %arg6[%c0_11, %c0_12] : memref<96x128xbf16, #tpu.memory_space<vmem>>, vector<96x128xbf16>
    %cst_13 = arith.constant dense<0.000000e+00> : vector<8x128xf32>
    %21 = tpu.matmul %13, %20, %cst_13 {dimension_numbers = #tpu.dot_dimension_numbers<[1], [0], [0], [1], [0, 0, 1, 1], [], []>} : vector<8x96xbf16>, vector<96x128xbf16>, vector<8x128xf32> -> vector<8x128xf32>
    %22 = arith.mulf %15, %17 : vector<8x32xf32>
    %23 = arith.truncf %19 : vector<8x128xf32> to vector<8x128xbf16>
    %c0_14 = arith.constant 0 : index
    %c0_15 = arith.constant 0 : index
    %24 = vector.load %arg7[%c0_14, %c0_15] : memref<128x128xbf16, #tpu.memory_space<vmem>>, vector<128x128xbf16>
    %cst_16 = arith.constant dense<0.000000e+00> : vector<8x128xf32>
    %25 = tpu.matmul %23, %24, %cst_16 {dimension_numbers = #tpu.dot_dimension_numbers<[1], [0], [0], [1], [0, 0, 1, 1], [], []>} : vector<8x128xbf16>, vector<128x128xbf16>, vector<8x128xf32> -> vector<8x128xf32>
    %26 = arith.truncf %21 : vector<8x128xf32> to vector<8x128xbf16>
    %c0_17 = arith.constant 0 : index
    %c0_18 = arith.constant 0 : index
    %27 = vector.load %arg8[%c0_17, %c0_18] : memref<128x128xbf16, #tpu.memory_space<vmem>>, vector<128x128xbf16>
    %cst_19 = arith.constant dense<0.000000e+00> : vector<8x128xf32>
    %28 = tpu.matmul %26, %27, %cst_19 {dimension_numbers = #tpu.dot_dimension_numbers<[1], [0], [0], [1], [0, 0, 1, 1], [], []>} : vector<8x128xbf16>, vector<128x128xbf16>, vector<8x128xf32> -> vector<8x128xf32>
    %29 = arith.addf %25, %28 : vector<8x128xf32>
    %c0_20 = arith.constant 0 : index
    %c0_21 = arith.constant 0 : index
    %30 = vector.load %arg9[%c0_20, %c0_21] : memref<1x128xf32, #tpu.memory_space<vmem>>, vector<1x128xf32>
    %31 = vector.broadcast %30 : vector<1x128xf32> to vector<8x128xf32>
    %32 = arith.addf %29, %31 : vector<8x128xf32>
    %cst_22 = arith.constant 0.000000e+00 : f32
    %33 = vector.broadcast %cst_22 : f32 to vector<8x128xf32>
    %34 = arith.maximumf %32, %33 : vector<8x128xf32>
    %35 = arith.truncf %34 : vector<8x128xf32> to vector<8x128xbf16>
    %c0_23 = arith.constant 0 : index
    %c0_24 = arith.constant 0 : index
    %36 = vector.load %arg10[%c0_23, %c0_24] : memref<128x64xbf16, #tpu.memory_space<vmem>>, vector<128x64xbf16>
    %cst_25 = arith.constant dense<0.000000e+00> : vector<8x64xf32>
    %37 = tpu.matmul %35, %36, %cst_25 {dimension_numbers = #tpu.dot_dimension_numbers<[1], [0], [0], [1], [0, 0, 1, 1], [], []>} : vector<8x128xbf16>, vector<128x64xbf16>, vector<8x64xf32> -> vector<8x64xf32>
    %c0_26 = arith.constant 0 : index
    %c0_27 = arith.constant 0 : index
    %38 = vector.load %arg11[%c0_26, %c0_27] : memref<1x64xf32, #tpu.memory_space<vmem>>, vector<1x64xf32>
    %39 = vector.broadcast %38 : vector<1x64xf32> to vector<8x64xf32>
    %40 = arith.addf %37, %39 : vector<8x64xf32>
    %cst_28 = arith.constant 0.000000e+00 : f32
    %41 = vector.broadcast %cst_28 : f32 to vector<8x64xf32>
    %42 = arith.maximumf %40, %41 : vector<8x64xf32>
    %43 = arith.truncf %42 : vector<8x64xf32> to vector<8x64xbf16>
    %c0_29 = arith.constant 0 : index
    %c0_30 = arith.constant 0 : index
    %44 = vector.load %arg12[%c0_29, %c0_30] : memref<64x32xbf16, #tpu.memory_space<vmem>>, vector<64x32xbf16>
    %cst_31 = arith.constant dense<0.000000e+00> : vector<8x32xf32>
    %45 = tpu.matmul %43, %44, %cst_31 {dimension_numbers = #tpu.dot_dimension_numbers<[1], [0], [0], [1], [0, 0, 1, 1], [], []>} : vector<8x64xbf16>, vector<64x32xbf16>, vector<8x32xf32> -> vector<8x32xf32>
    %c0_32 = arith.constant 0 : index
    %c0_33 = arith.constant 0 : index
    %46 = vector.load %arg13[%c0_32, %c0_33] : memref<1x32xf32, #tpu.memory_space<vmem>>, vector<1x32xf32>
    %47 = vector.broadcast %46 : vector<1x32xf32> to vector<8x32xf32>
    %48 = arith.addf %45, %47 : vector<8x32xf32>
    %cst_34 = arith.constant 0.000000e+00 : f32
    %49 = vector.broadcast %cst_34 : f32 to vector<8x32xf32>
    %50 = arith.maximumf %48, %49 : vector<8x32xf32>
    %c0_35 = arith.constant 0 : index
    %c0_36 = arith.constant 0 : index
    %51 = vector.load %arg14[%c0_35, %c0_36] : memref<1x32xf32, #tpu.memory_space<vmem>>, vector<1x32xf32>
    %52 = vector.broadcast %51 : vector<1x32xf32> to vector<8x32xf32>
    %53 = arith.mulf %22, %52 : vector<8x32xf32>
    %cst_37 = arith.constant dense<0.000000e+00> : vector<8xf32>
    %54 = vector.multi_reduction <add>, %53, %cst_37 [1] : vector<8x32xf32> to vector<8xf32>
    %55 = vector.shape_cast %54 : vector<8xf32> to vector<8x1xf32>
    %c0_38 = arith.constant 0 : index
    %c0_39 = arith.constant 0 : index
    %56 = vector.load %arg15[%c0_38, %c0_39] : memref<1x32xf32, #tpu.memory_space<vmem>>, vector<1x32xf32>
    %57 = vector.broadcast %56 : vector<1x32xf32> to vector<8x32xf32>
    %58 = arith.mulf %50, %57 : vector<8x32xf32>
    %cst_40 = arith.constant dense<0.000000e+00> : vector<8xf32>
    %59 = vector.multi_reduction <add>, %58, %cst_40 [1] : vector<8x32xf32> to vector<8xf32>
    %60 = vector.shape_cast %59 : vector<8xf32> to vector<8x1xf32>
    %61 = arith.addf %55, %60 : vector<8x1xf32>
    %c0_41 = arith.constant 0 : index
    %c0_42 = arith.constant 0 : index
    %62 = vector.load %arg16[%c0_41, %c0_42] : memref<1x1xf32, #tpu.memory_space<vmem>>, vector<1x1xf32>
    %63 = vector.broadcast %62 : vector<1x1xf32> to vector<8x1xf32>
    %64 = arith.addf %61, %63 : vector<8x1xf32>
    %65 = tpu.transpose %64, [1, 0] : vector<8x1xf32> -> vector<1x8xf32>
    %c0_43 = arith.constant 0 : index
    %c0_44 = arith.constant 0 : index
    %66 = vector.load %arg17[%c0_43, %c0_44] : memref<1x8xf32, #tpu.memory_space<vmem>>, vector<1x8xf32>
    tpu.vector_store %arg17[%c0_43, %c0_44], %65 {strides = array<i32>} : memref<1x8xf32, #tpu.memory_space<vmem>>, vector<1x8xf32>,
    return
  }
  func.func @transform_0(%arg0: i32) -> (i32, i32) {
    %c0_i32 = arith.constant 0 : i32
    %c0_i32_0 = arith.constant 0 : i32
    return %arg0, %c0_i32 : i32, i32
  }
  func.func @transform_1(%arg0: i32) -> (i32, i32) {
    %c0_i32 = arith.constant 0 : i32
    %c0_i32_0 = arith.constant 0 : i32
    return %arg0, %c0_i32 : i32, i32
  }
  func.func @transform_2(%arg0: i32) -> (i32, i32) {
    %c0_i32 = arith.constant 0 : i32
    %c0_i32_0 = arith.constant 0 : i32
    %c0_i32_1 = arith.constant 0 : i32
    return %c0_i32, %c0_i32_0 : i32, i32
  }
  func.func @transform_3(%arg0: i32) -> (i32, i32) {
    %c0_i32 = arith.constant 0 : i32
    %c0_i32_0 = arith.constant 0 : i32
    %c0_i32_1 = arith.constant 0 : i32
    return %c0_i32, %c0_i32_0 : i32, i32
  }
  func.func @transform_4(%arg0: i32) -> (i32, i32) {
    %c0_i32 = arith.constant 0 : i32
    %c0_i32_0 = arith.constant 0 : i32
    %c0_i32_1 = arith.constant 0 : i32
    return %c0_i32, %c0_i32_0 : i32, i32
  }
  func.func @transform_5(%arg0: i32) -> (i32, i32) {
    %c0_i32 = arith.constant 0 : i32
    %c0_i32_0 = arith.constant 0 : i32
    %c0_i32_1 = arith.constant 0 : i32
    return %c0_i32, %c0_i32_0 : i32, i32
  }
  func.func @transform_6(%arg0: i32) -> (i32, i32) {
    %c0_i32 = arith.constant 0 : i32
    %c0_i32_0 = arith.constant 0 : i32
    %c0_i32_1 = arith.constant 0 : i32
    return %c0_i32, %c0_i32_0 : i32, i32
  }
  func.func @transform_7(%arg0: i32) -> (i32, i32) {
    %c0_i32 = arith.constant 0 : i32
    %c0_i32_0 = arith.constant 0 : i32
    %c0_i32_1 = arith.constant 0 : i32
    return %c0_i32, %c0_i32_0 : i32, i32
  }
  func.func @transform_8(%arg0: i32) -> (i32, i32) {
    %c0_i32 = arith.constant 0 : i32
    %c0_i32_0 = arith.constant 0 : i32
    %c0_i32_1 = arith.constant 0 : i32
    return %c0_i32, %c0_i32_0 : i32, i32
  }
  func.func @transform_9(%arg0: i32) -> (i32, i32) {
    %c0_i32 = arith.constant 0 : i32
    %c0_i32_0 = arith.constant 0 : i32
    %c0_i32_1 = arith.constant 0 : i32
    return %c0_i32, %c0_i32_0 : i32, i32
  }
  func.func @transform_10(%arg0: i32) -> (i32, i32) {
    %c0_i32 = arith.constant 0 : i32
    %c0_i32_0 = arith.constant 0 : i32
    %c0_i32_1 = arith.constant 0 : i32
    return %c0_i32, %c0_i32_0 : i32, i32
  }
  func.func @transform_11(%arg0: i32) -> (i32, i32) {
    %c0_i32 = arith.constant 0 : i32
    %c0_i32_0 = arith.constant 0 : i32
    %c0_i32_1 = arith.constant 0 : i32
    return %c0_i32, %c0_i32_0 : i32, i32
  }
  func.func @transform_12(%arg0: i32) -> (i32, i32) {
    %c0_i32 = arith.constant 0 : i32
    %c0_i32_0 = arith.constant 0 : i32
    %c0_i32_1 = arith.constant 0 : i32
    return %c0_i32, %c0_i32_0 : i32, i32
  }
  func.func @transform_13(%arg0: i32) -> (i32, i32) {
    %c0_i32 = arith.constant 0 : i32
    %c0_i32_0 = arith.constant 0 : i32
    %c0_i32_1 = arith.constant 0 : i32
    return %c0_i32, %c0_i32_0 : i32, i32
  }
  func.func @transform_14(%arg0: i32) -> (i32, i32) {
    %c0_i32 = arith.constant 0 : i32
    %c0_i32_0 = arith.constant 0 : i32
    %c0_i32_1 = arith.constant 0 : i32
    return %c0_i32, %c0_i32_0 : i32, i32
  }
  func.func @transform_15(%arg0: i32) -> (i32, i32) {
    %c0_i32 = arith.constant 0 : i32
    %c0_i32_0 = arith.constant 0 : i32
    %c0_i32_1 = arith.constant 0 : i32
    return %c0_i32, %c0_i32_0 : i32, i32
  }
  func.func @transform_16(%arg0: i32) -> (i32, i32) {
    %c0_i32 = arith.constant 0 : i32
    %c0_i32_0 = arith.constant 0 : i32
    return %c0_i32, %arg0 : i32, i32
  }
}

</mosaic_0001>

<bundles_post_ra>
// kernel: ncf_forward.1
= control target key start
LH: loop header
LB: loop body
LE: loop exit
PB: predicated region body
PF: predicated region fallthrough
CT: control target
= control target key end

     0   :  { %s1564_s0 = inlined_call_operand.vmem [shape: s32[8,1], index: 0, kind: input, shape index: {}]   ;;  %s1565_s1 = inlined_call_operand.vmem [shape: s32[8,1], index: 1, kind: input, shape index: {}]   ;;  %s1566_s2 = inlined_call_operand.vmem [shape: bf16[64,32], index: 2, kind: input, shape index: {}]   ;;  %s1567_s3 = inlined_call_operand.vmem [shape: bf16[96,32], index: 3, kind: input, shape index: {}]   ;;  %s1568_s4 = inlined_call_operand.vmem [shape: bf16[64,128], index: 4, kind: input, shape index: {}]   ;;  %s1569_s5 = inlined_call_operand.vmem [shape: bf16[96,128], index: 5, kind: input, shape index: {}]   ;;  %s1570_s6 = inlined_call_operand.vmem [shape: bf16[128,128], index: 6, kind: input, shape index: {}]   ;;  %s1571_s7 = inlined_call_operand.vmem [shape: bf16[128,128], index: 7, kind: input, shape index: {}]   ;;  %s1572_s8 = inlined_call_operand.vmem [shape: f32[1,128], index: 8, kind: input, shape index: {}]   ;;  %s1573_s9 = inlined_call_operand.vmem [shape: bf16[128,64], index: 9, kind: input, shape index: {}]   ;;  %s1574_s10 = inlined_call_operand.vmem [shape: f32[1,64], index: 10, kind: input, shape index: {}]   ;;  %s1575_s11 = inlined_call_operand.vmem [shape: bf16[64,32], index: 11, kind: input, shape index: {}]   ;;  %s1576_s12 = inlined_call_operand.vmem [shape: f32[1,32], index: 12, kind: input, shape index: {}]   ;;  %s1577_s13 = inlined_call_operand.vmem [shape: f32[1,32], index: 13, kind: input, shape index: {}]   ;;  %s1578_s14 = inlined_call_operand.vmem [shape: f32[1,32], index: 14, kind: input, shape index: {}]   ;;  %s1579_s15 = inlined_call_operand.<no memory space> [shape: f32[1,1], index: 15, kind: input, shape index: {}]   ;;  %s1580_s16 = inlined_call_operand.hbm [shape: f32[1,8], index: 16, kind: output, shape index: {}]  }
   0x1   :  { %1581 = sst [smem:[#allocation6_spill]] %s1564_s0  ;;  %v21_v0 = vstv %s1579_s15 }
   0x2   :  { %22 = vst [vmem:[#allocation2] sm:$0x1] %v21_v0 }
   0x3   :  { %v58_v1 = vld [vmem:[%s1565_s1] sm:$0xff]  ;;  %v1222_v2 = vmov 0   ;;  %v1223_v3 = vmov 0.0   ;;  %s1582_s29 = sld [smem:[#allocation6_spill]]  ;;  %v1151_v6 = vld [vmem:[%s1567_s3 + $0x8] sm:$0xff]   ;;  %vm1224_vm0 = vmmov 0  }
   0x4   :  { %1149 = vset.pattern.permute.xlu0 %v1222_v2  ;;  %1029 = vmatprep.subr.bf16.mxu1 %v1223_v3  ;;  %v1150_v4 = vld [vmem:[%s1567_s3] sm:$0xff]   ;;  %v1155_v8 = vld [vmem:[%s1566_s2 + $0x8] sm:$0xff]   ;;  %v1152_v9 = vld [vmem:[%s1567_s3 + $0x10] sm:$0xff]  }
   0x5   :  { %69 = vperm.xlu0 %1149, %v58_v1   ;;  %1017 = vmatprep.subr.bf16.mxu0 %v1223_v3  ;;  %v1153_v7 = vld [vmem:[%s1566_s2] sm:$0xff]   ;;  %v1157_v10 = vld [vmem:[%s1566_s2 + $0x10] sm:$0xff]   ;;  %v1154_v11 = vld [vmem:[%s1567_s3 + $0x18] sm:$0xff]  }
   0x6   :  { %1030 = vmatpush3.bf16.msra.mxu1 %v1150_v4  ;;  %1041 = vmatprep.mubr.msk.bf16.mxu1 %vm1224_vm0, %v1223_v3  ;;  %v1159_v12 = vld [vmem:[%s1566_s2 + $0x18] sm:$0xff]   ;;  %v1156_v13 = vld [vmem:[%s1567_s3 + $0x20] sm:$0xff]   ;;  %v1158_v14 = vld [vmem:[%s1567_s3 + $0x28] sm:$0xff]  }
   0x7   :  { %1031 = vmatprep.subr.bf16.mxu1 %v1223_v3  ;;  %1025 = vmatprep.mubr.msk.bf16.mxu0 %vm1224_vm0, %v1223_v3 }
   0x8   :  { %1018 = vmatpush3.bf16.msra.mxu0 %v1153_v7 }
   0x9   :  { %v57_v5 = vld [vmem:[%s1582_s29] sm:$0xff]  ;;  %1019 = vmatprep.subr.bf16.mxu0 %v1223_v3 }
   0xa   :  { %62 = vperm.xlu0 %1149, %v57_v5   ;;  %1032 = vmatpush3.bf16.msra.mxu1 %v1151_v6 }
   0xb   :  { %1033 = vmatprep.subr.bf16.mxu1 %v1223_v3 }
   0xc   :  { %1020 = vmatpush3.bf16.msra.mxu0 %v1155_v8 }
   0xd   :  { %1021 = vmatprep.subr.bf16.mxu0 %v1223_v3 }
   0xe   :  { %1034 = vmatpush3.bf16.msra.mxu1 %v1152_v9 }
   0xf   :  { %1035 = vmatprep.subr.bf16.mxu1 %v1223_v3 }
  0x10   :  { %1022 = vmatpush3.bf16.msra.mxu0 %v1157_v10 }
  0x11   :  { %1023 = vmatprep.subr.bf16.mxu0 %v1223_v3 }
  0x12   :  { %1036 = vmatpush3.bf16.msra.mxu1 %v1154_v11 }
  0x13   :  { %1037 = vmatprep.subr.bf16.mxu1 %v1223_v3 }
  0x14   :  { %1024 = vmatpush3.bf16.msra.mxu0 %v1159_v12 }
  0x15   :  { %1045 = vmatprep.subr.bf16.mxu0 %v1223_v3 }
  0x16   :  { %1038 = vmatpush3.bf16.msra.mxu1 %v1156_v13 }
  0x17   :  { %1039 = vmatprep.subr.bf16.mxu1 %v1223_v3 }
  0x1a   :  { %1040 = vmatpush3.bf16.msra.mxu1 %v1158_v14 }
  0x1b   :  { %1057 = vmatprep.subr.bf16.mxu1 %v1223_v3 }
  0x1c   :  { %23 = vsyncpa [#allocation4], 0  ;;  %v59_v15 = vlaneseq  ;;  %vm199_vm2 = vcmask 785408   ;;  %v1160_v19 = vld [vmem:[%s1569_s5] sm:$0xff]   ;;  %vm107_vm4 = vcmask 523264   ;;  %v1162_v24 = vld [vmem:[%s1569_s5 + $0x8] sm:$0xff]  }
  0x1d   :  { %v1161_v23 = vld [vmem:[%s1568_s4] sm:$0xff]   ;;  %v1163_v26 = vld [vmem:[%s1568_s4 + $0x8] sm:$0xff]   ;;  %v1164_v27 = vld [vmem:[%s1569_s5 + $0x10] sm:$0xff]   ;;  %vm828_vm5 = vcmask 261120   ;;  %vm884_vm6 = vcmask 57344  }
  0x1e   :  { %v60_v16 = vand.u32 127, %v59_v15  ;;  %v1165_v28 = vld [vmem:[%s1568_s4 + $0x10] sm:$0xff]   ;;  %v1166_v29 = vld [vmem:[%s1569_s5 + $0x18] sm:$0xff]   ;;  %v1168_v31 = vld [vmem:[%s1569_s5 + $0x20] sm:$0xff]  }
  0x1f   :  { %v1167_v30 = vld [vmem:[%s1568_s4 + $0x18] sm:$0xff]   ;;  %v1169_v32 = vld [vmem:[%s1569_s5 + $0x28] sm:$0xff]   ;;  %v1171_v33 = vld [vmem:[%s1571_s7] sm:$0xff]  }
  0x20   :  { %v1170_v34 = vld [vmem:[%s1570_s6] sm:$0xff]   ;;  %v1173_v35 = vld [vmem:[%s1571_s7 + $0x8] sm:$0xff]   ;;  %v1174_v37 = vld [vmem:[%s1570_s6 + $0x10] sm:$0xff]  }
  0x21   :  { %v1172_v36 = vld [vmem:[%s1570_s6 + $0x8] sm:$0xff]   ;;  %v1175_v38 = vld [vmem:[%s1571_s7 + $0x10] sm:$0xff]   ;;  %v1176_v39 = vld [vmem:[%s1570_s6 + $0x18] sm:$0xff]  }
  0x22   :  { %v1177_v40 = vld [vmem:[%s1571_s7 + $0x18] sm:$0xff]   ;;  %v1178_v41 = vld [vmem:[%s1570_s6 + $0x20] sm:$0xff]   ;;  %v1180_v43 = vld [vmem:[%s1570_s6 + $0x28] sm:$0xff]  }
  0x23   :  { %v1179_v42 = vld [vmem:[%s1571_s7 + $0x20] sm:$0xff]   ;;  %v1181_v44 = vld [vmem:[%s1571_s7 + $0x28] sm:$0xff]   ;;  %v1182_v45 = vld [vmem:[%s1570_s6 + $0x30] sm:$0xff]  }
  0x24   :  { %v1183_v46 = vld [vmem:[%s1571_s7 + $0x30] sm:$0xff]   ;;  %v1184_v47 = vld [vmem:[%s1570_s6 + $0x38] sm:$0xff]   ;;  %v958_v54 = vld [vmem:[%s1577_s13] ss:$0 sm:$0xff] }
  0x25   :  { %v1185_v48 = vld [vmem:[%s1571_s7 + $0x38] sm:$0xff]   ;;  %v1186_v4 = vld [vmem:[%s1573_s9] sm:$0xff]   ;;  %v1187_v9 = vld [vmem:[%s1573_s9 + $0x8] sm:$0xff]  }
  0x26   :  { %v1188_v10 = vld [vmem:[%s1573_s9 + $0x10] sm:$0xff]   ;;  %v1189_v11 = vld [vmem:[%s1573_s9 + $0x18] sm:$0xff]   ;;  %v1190_v12 = vld [vmem:[%s1573_s9 + $0x20] sm:$0xff]  }
  0x27   :  { %v1191_v13 = vld [vmem:[%s1573_s9 + $0x28] sm:$0xff]   ;;  %v1192_v14 = vld [vmem:[%s1573_s9 + $0x30] sm:$0xff]   ;;  %v1193_v15 = vld [vmem:[%s1573_s9 + $0x38] sm:$0xff]  }
  0x84   :  { %v70_v17 = vpop.permute.xlu0 %69 }
  0x85   :  { %vm71_vm1 = vcmp.eq.s32.totalorder %v70_v17, %v60_v16  ;;  %v1195_v17 = vld [vmem:[%s1575_s11 + $0x8] sm:$0xff]  }
  0x86   :  { %v901_v18 = vsel %vm71_vm1, 1.0, %v1223_v3 }
  0x87   :  { %v74_v20 = vpack.c.bf16 %v901_v18, %v901_v18 }
  0x89   :  { %v63_v21 = vpop.permute.xlu0 %62  ;;  %1042 = vmatmul.mubr.msk.bf16.vlgmr.msra.gmra.mrb[0].mxu1 %vm199_vm2, %v74_v20 }
  0x8a   :  { %vm64_vm3 = vcmp.eq.s32.totalorder %v63_v21, %v60_v16  ;;  %1058 = vmatpush3.bf16.msra.mxu1 %v1160_v19  ;;  %1069 = vmatprep.mubr.msk.bf16.mxu1 %vm1224_vm0, %v1223_v3  ;;  %v1194_v16 = vld [vmem:[%s1575_s11] sm:$0xff]  }
  0x8b   :  { %v900_v22 = vsel %vm64_vm3, 1.0, %v1223_v3  ;;  %1059 = vmatprep.subr.bf16.mxu1 %v1223_v3 }
  0x8c   :  { %v67_v25 = vpack.c.bf16 %v900_v22, %v900_v22 }
  0x8e   :  { %1026 = vmatmul.mubr.msk.bf16.vlgmr.msra.gmra.mrb[0].mxu0 %vm107_vm4, %v67_v25  ;;  %1060 = vmatpush3.bf16.msra.mxu1 %v1162_v24 }
  0x8f   :  { %1046 = vmatpush3.bf16.msra.mxu0 %v1161_v23  ;;  %1061 = vmatprep.subr.bf16.mxu1 %v1223_v3  ;;  %v942_v23 = vld [vmem:[%s1572_s8] ss:$0 sm:$0xff] }
  0x90   :  { %1047 = vmatprep.subr.bf16.mxu0 %v1223_v3  ;;  %1053 = vmatprep.mubr.msk.bf16.mxu0 %vm1224_vm0, %v1223_v3 }
  0x92   :  { %1062 = vmatpush3.bf16.msra.mxu1 %v1164_v27 }
  0x93   :  { %1048 = vmatpush3.bf16.msra.mxu0 %v1163_v26  ;;  %1063 = vmatprep.subr.bf16.mxu1 %v1223_v3 }
  0x94   :  { %1049 = vmatprep.subr.bf16.mxu0 %v1223_v3 }
  0x96   :  { %1064 = vmatpush3.bf16.msra.mxu1 %v1166_v29 }
  0x97   :  { %1050 = vmatpush3.bf16.msra.mxu0 %v1165_v28  ;;  %1065 = vmatprep.subr.bf16.mxu1 %v1223_v3 }
  0x98   :  { %1051 = vmatprep.subr.bf16.mxu0 %v1223_v3 }
  0x9a   :  { %1066 = vmatpush3.bf16.msra.mxu1 %v1168_v31  ;;  %v1196_v31 = vld [vmem:[%s1575_s11 + $0x10] sm:$0xff]  }
  0x9b   :  { %1052 = vmatpush3.bf16.msra.mxu0 %v1167_v30  ;;  %1067 = vmatprep.subr.bf16.mxu1 %v1223_v3 }
  0x9c   :  { %1073 = vmatprep.subr.bf16.mxu0 %v1223_v3 }
  0x9e   :  { %1054 = vmatmul.mubr.msk.bf16.vlgmr.msra.gmra.mrb[4].mxu0 %vm107_vm4, %v67_v25  ;;  %1068 = vmatpush3.bf16.msra.mxu1 %v1169_v32  ;;  %v1197_v32 = vld [vmem:[%s1575_s11 + $0x18] sm:$0xff]  }
  0x9f   :  { %1074 = vmatpush3.bf16.msra.mxu0 %v1171_v33  ;;  %1093 = vmatprep.subr.bf16.mxu1 %v1223_v3  ;;  %v943_v33 = vld [vmem:[%s1574_s10] ss:$0 sm:$0xff]  ;;  %s1225_s10 = smov [#allocation3]  }
  0xa0   :  { %1075 = vmatprep.subr.bf16.mxu0 %v1223_v3  ;;  %1089 = vmatprep.mubr.msk.bf16.mxu0 %vm1224_vm0, %v1223_v3 }
  0xa1   :  { %1070 = vmatmul.mubr.msk.bf16.vlgmr.msra.gmra.mrb[4].mxu1 %vm199_vm2, %v74_v20 }
  0xa2   :  { %1094 = vmatpush3.bf16.msra.mxu1 %v1170_v34  ;;  %1109 = vmatprep.mubr.msk.bf16.mxu1 %vm1224_vm0, %v1223_v3 }
  0xa3   :  { %1076 = vmatpush3.bf16.msra.mxu0 %v1173_v35  ;;  %1095 = vmatprep.subr.bf16.mxu1 %v1223_v3 }
  0xa4   :  { %1077 = vmatprep.subr.bf16.mxu0 %v1223_v3 }
  0xa6   :  { %1096 = vmatpush3.bf16.msra.mxu1 %v1172_v36 }
  0xa7   :  { %1097 = vmatprep.subr.bf16.mxu1 %v1223_v3  ;;  %1078 = vmatpush3.bf16.msra.mxu0 %v1175_v38 }
  0xa8   :  { %1079 = vmatprep.subr.bf16.mxu0 %v1223_v3 }
  0xaa   :  { %1098 = vmatpush3.bf16.msra.mxu1 %v1174_v37 }
  0xab   :  { %1099 = vmatprep.subr.bf16.mxu1 %v1223_v3  ;;  %1080 = vmatpush3.bf16.msra.mxu0 %v1177_v40 }
  0xac   :  { %1081 = vmatprep.subr.bf16.mxu0 %v1223_v3 }
  0xae   :  { %1100 = vmatpush3.bf16.msra.mxu1 %v1176_v39 }
  0xaf   :  { %1101 = vmatprep.subr.bf16.mxu1 %v1223_v3  ;;  %1082 = vmatpush3.bf16.msra.mxu0 %v1179_v42 }
  0xb0   :  { %1083 = vmatprep.subr.bf16.mxu0 %v1223_v3 }
  0xb2   :  { %1102 = vmatpush3.bf16.msra.mxu1 %v1178_v41 }
  0xb3   :  { %1103 = vmatprep.subr.bf16.mxu1 %v1223_v3  ;;  %1084 = vmatpush3.bf16.msra.mxu0 %v1181_v44 }
  0xb4   :  { %1085 = vmatprep.subr.bf16.mxu0 %v1223_v3 }
  0xb6   :  { %1104 = vmatpush3.bf16.msra.mxu1 %v1180_v43 }
  0xb7   :  { %1105 = vmatprep.subr.bf16.mxu1 %v1223_v3  ;;  %1086 = vmatpush3.bf16.msra.mxu0 %v1183_v46 }
  0xb8   :  { %1087 = vmatprep.subr.bf16.mxu0 %v1223_v3 }
  0xba   :  { %1106 = vmatpush3.bf16.msra.mxu1 %v1182_v45  ;;  %v959_v45 = vld [vmem:[%s1578_s14] ss:$0 sm:$0xff] }
  0xbb   :  { %1107 = vmatprep.subr.bf16.mxu1 %v1223_v3  ;;  %1088 = vmatpush3.bf16.msra.mxu0 %v1185_v48 }
  0xbc   :  { %1113 = vmatprep.subr.bf16.mxu0 %v1223_v3 }
  0xbe   :  { %1108 = vmatpush3.bf16.msra.mxu1 %v1184_v47 }
  0xbf   :  { %1133 = vmatprep.subr.bf16.mxu1 %v1223_v3 }
 0x15c   :  { %v237_v49 = vpop.f32.mrb[0].mxu1 }
 0x15d   :  { %v1043_v50 = vpop.f32.mrb[1].mxu1 }
 0x15e   :  { %v240_v51 = vpop.f32.mrb[2].mxu1 }
 0x15f   :  { %v1044_v52 = vpop.f32.mrb[3].mxu1  ;;  %v960_v51 = vld [vmem:[#allocation2] ss:$0 sm:$0xff] }
 0x161   :  { %v145_v53 = vpop.f32.mrb[0].mxu0 }
 0x162   :  { %v403_v55 = vmul.f32 %v237_v49, %v145_v53  ;;  %v1027_v56 = vpop.f32.mrb[1].mxu0 }
 0x163   :  { %v148_v57 = vpop.f32.mrb[2].mxu0 }
 0x164   :  { %v1028_v58 = vpop.f32.mrb[3].mxu0  ;;  %v827_v59 = vmul.f32 %v958_v54, %v403_v55 }
 0x166   :  { %v829_v60 = vsel %vm828_vm5, %v827_v59, 0.0 }
 0x167   :  { %830 = vadd.xlane.f32.xlu1 %v829_v60 }
 0x171   :  { %v309_v61 = vpop.f32.mrb[4].mxu0 }
 0x172   :  { %v404_v62 = vpack.c.bf16 %v309_v61, %v309_v61  ;;  %v1055_v63 = vpop.f32.mrb[5].mxu0 }
 0x173   :  { %v312_v0 = vpop.f32.mrb[6].mxu0 }
 0x174   :  { %v1056_v1 = vpop.f32.mrb[7].mxu0  ;;  %1110 = vmatmul.mubr.bf16.vlgmr.msra.gmra.mrb[8].mxu1 %v404_v62  ;;  %v397_v2 = vpop.f32.mrb[4].mxu1 }
 0x175   :  { %1141 = vmatprep.mubr.msk.bf16.mxu1 %vm1224_vm0, %v1223_v3  ;;  %v421_v5 = vpack.c.bf16 %v397_v2, %v397_v2  ;;  %v1071_v6 = vpop.f32.mrb[5].mxu1  ;;  %1134 = vmatpush3.bf16.msra.mxu1 %v1194_v16 }
 0x176   :  { %v400_v7 = vpop.f32.mrb[6].mxu1  ;;  %1135 = vmatprep.subr.bf16.mxu1 %v1223_v3 }
 0x177   :  { %v1072_v8 = vpop.f32.mrb[7].mxu1  ;;  %1090 = vmatmul.mubr.bf16.vlgmr.msra.gmra.mrb[8].mxu0 %v421_v5 }
 0x178   :  { %1114 = vmatpush3.bf16.msra.mxu0 %v1186_v4  ;;  %1129 = vmatprep.mubr.msk.bf16.mxu0 %vm1224_vm0, %v1223_v3 }
 0x179   :  { %1115 = vmatprep.subr.bf16.mxu0 %v1223_v3  ;;  %1136 = vmatpush3.bf16.msra.mxu1 %v1195_v17 }
 0x17a   :  { %1137 = vmatprep.subr.bf16.mxu1 %v1223_v3 }
 0x17c   :  { %1116 = vmatpush3.bf16.msra.mxu0 %v1187_v9 }
 0x17d   :  { %1117 = vmatprep.subr.bf16.mxu0 %v1223_v3  ;;  %1138 = vmatpush3.bf16.msra.mxu1 %v1196_v31 }
 0x17e   :  { %1139 = vmatprep.subr.bf16.mxu1 %v1223_v3 }
 0x180   :  { %1118 = vmatpush3.bf16.msra.mxu0 %v1188_v10 }
 0x181   :  { %1119 = vmatprep.subr.bf16.mxu0 %v1223_v3  ;;  %1140 = vmatpush3.bf16.msra.mxu1 %v1197_v32 }
 0x184   :  { %1120 = vmatpush3.bf16.msra.mxu0 %v1189_v11 }
 0x185   :  { %1121 = vmatprep.subr.bf16.mxu0 %v1223_v3 }
 0x188   :  { %1122 = vmatpush3.bf16.msra.mxu0 %v1190_v12 }
 0x189   :  { %1123 = vmatprep.subr.bf16.mxu0 %v1223_v3 }
 0x18c   :  { %1124 = vmatpush3.bf16.msra.mxu0 %v1191_v13 }
 0x18d   :  { %1125 = vmatprep.subr.bf16.mxu0 %v1223_v3 }
 0x190   :  { %1126 = vmatpush3.bf16.msra.mxu0 %v1192_v14 }
 0x191   :  { %1127 = vmatprep.subr.bf16.mxu0 %v1223_v3  ;;  %v952_v3 = vld [vmem:[%s1576_s12] ss:$0 sm:$0xff]  ;;  %s892_s12 = sshll.u32 %s1225_s10, 4  ;;  %s893_s12 = int_to_ptr.vmem [resolvable:$true] %s892_s12 }
 0x192   :  { %s1198_s26 = scalar_lea.vmem %s893_s12, 16  ;;  %s1202_s14 = scalar_lea.vmem %s893_s12, 32 }
 0x193   :  { %p1199_p0 = scmp.ne.s32.totalorder %s893_s12, %s1198_s26  ;;  %p1203_p1 = scmp.lt.s32.totalorder %s893_s12, %s893_s12 }
 0x194   :  { %1128 = vmatpush3.bf16.msra.mxu0 %v1193_v15  ;;  %p1204_p2 = scmp.lt.s32.totalorder %s1202_s14, %s1198_s26 }
 0x196   :  { %p1205_p3 = por %p1204_p2, %p1203_p1 }
 0x198   :  { %p1206_p4 = pnand %p1205_p3, %p1199_p0 }
 0x1f4   :  { %v831_v50 = vpop.xlane.xlu1 %830 }
 0x247   :  { %v608_v18 = vpop.f32.mrb[8].mxu1 }
 0x248   :  { %v1111_v19 = vpop.f32.mrb[9].mxu1 }
 0x249   :  { %v611_v20 = vpop.f32.mrb[10].mxu1 }
 0x24a   :  { %v1112_v21 = vpop.f32.mrb[11].mxu1  ;;  %v520_v22 = vpop.f32.mrb[8].mxu0 }
 0x24b   :  { %v609_v24 = vadd.f32 %v608_v18, %v520_v22  ;;  %v1091_v25 = vpop.f32.mrb[9].mxu0 }
 0x24c   :  { %v523_v26 = vpop.f32.mrb[10].mxu0 }
 0x24d   :  { %v621_v27 = vadd.f32 %v942_v23, %v609_v24  ;;  %v1092_v28 = vpop.f32.mrb[11].mxu0 }
 0x24f   :  { %v622_v29 = vmax.f32 %v621_v27, 0.0 }
 0x251   :  { %v623_v30 = vpack.c.bf16 %v622_v29, %v622_v29 }
 0x253   :  { %1130 = vmatmul.mubr.bf16.vlgmr.msra.gmra.mrb[12].mxu0 %v623_v30 }
 0x326   :  { %v729_v34 = vpop.f32.mrb[12].mxu0 }
 0x327   :  { %v730_v35 = vadd.f32 %v943_v33, %v729_v34  ;;  %v1131_v36 = vpop.f32.mrb[13].mxu0 }
 0x328   :  { %v732_v37 = vpop.f32.mrb[14].mxu0 }
 0x329   :  { %v735_v38 = vmax.f32 %v730_v35, 0.0  ;;  %v1132_v39 = vpop.f32.mrb[15].mxu0 }
 0x32b   :  { %v736_v40 = vpack.c.bf16 %v735_v38, %v735_v38 }
 0x32d   :  { %1142 = vmatmul.mubr.msk.bf16.vlgmr.msra.gmra.mrb[12].mxu1 %vm107_vm4, %v736_v40 }
 0x400   :  { %v813_v41 = vpop.f32.mrb[12].mxu1 }
 0x401   :  { %v814_v42 = vadd.f32 %v952_v3, %v813_v41  ;;  %v1143_v43 = vpop.f32.mrb[13].mxu1 }
 0x402   :  { %v816_v44 = vpop.f32.mrb[14].mxu1 }
 0x403   :  { %v819_v46 = vmax.f32 %v814_v42, 0.0  ;;  %v1144_v47 = vpop.f32.mrb[15].mxu1 }
 0x405   :  { %v839_v48 = vmul.f32 %v959_v45, %v819_v46 }
 0x407   :  { %v840_v49 = vsel %vm828_vm5, %v839_v48, 0.0 }
 0x408   :  { %841 = vadd.xlane.f32.xlu1 %v840_v49 }
 0x495   :  { %v842_v52 = vpop.xlane.xlu1 %841 }
 0x496   :  { %v843_v53 = vadd.f32 %v842_v52, %v831_v50 }
 0x498   :  { %v851_v54 = vadd.f32 %v960_v51, %v843_v53 }
 0x49a   :  { %852 = vxpose.xlu0.b32.start.end [1/1] (short) (narrow) %v851_v54, 8 }
 0x51a   :  { %v868_v55 = vpop.trf.xlu0 }
 0x51b   :  { %885 = vst.msk [vmem:[#allocation3] sm:$0x1] %vm884_vm6, %v868_v55 }
 0x51c   :  { %1209 = shalt.err (!%p1206_p4)
}
 0x51d   :  { %s1210_s29 = scalar_lea.hbm %s1580_s16, 16 }
 0x51e   :  { %p1211_p5 = scmp.ne.s32.totalorder %s1580_s16, %s1210_s29  ;;  %p1214_p6 = scmp.lt.u32.totalorder %s1210_s29, %s1580_s16 }
 0x520   :  { %p1216_p7 = pnand %p1214_p6, %p1211_p5 }
 0x522   :  { %1219 = shalt.err (!%p1216_p7)
}
 0x523   :  { %895 = dma.vmem_to_hbm [thread:$0]  %s893_s12, 16, %s1580_s16, [#allocation4]  }
 0x524   :  { %1220 = dma.done.wait [#allocation4], 16  }
 0x525   :  { %1221 = vsyncadd [#allocation4], 4294967280 }
 0x526   :  { %899 = vsyncpa [#allocation4], 1 }

</bundles_post_ra>
